<compile_context>
chip_gen: v6e
topology: v6e:2x2x1
jax: 0.10.0
libtpu: 0.0.40
codegen_flags: <defaults>
</compile_context>

<pallas_src>
import functools

import jax
import jax.numpy as jnp
from jax.experimental import pallas as pl
from jax.experimental.pallas import tpu as pltpu

BN_EPS = 1e-5
LANE = 128
NEG_PAD = -1e30      # bias fill for padded softmax columns -> exp() == 0 in f32
_FUSED_MAX_B = 1024  # below this the whole batch comfortably fits in VMEM


def _round_up(n, m):
    return pl.cdiv(n, m) * m


# ---------------------------------------------------------------------------
# Kernels
# ---------------------------------------------------------------------------
def _softmax_rows(logits):
    """Row softmax. logits must be f32 so -1e30 padded columns give exp()==0."""
    m = jnp.max(logits, axis=1, keepdims=True)
    e = jnp.exp(logits - m)
    s = jnp.sum(e, axis=1, keepdims=True)
    r = pl.reciprocal(s, approx=True)   # EUP vrcp (free slot)
    r = r * (2.0 - s * r)               # one Newton step -> ~f32 accuracy
    return e * r


def _ddc_fused_kernel(x_ref, w1_ref, vec_ref, w2_ref, b2_ref, out_ref, hid_ref):
    """Whole-batch fused kernel (small B): Linear->ReLU->BN->Linear->Softmax."""
    b1 = vec_ref[0:1, :]
    gamma = vec_ref[1:2, :]
    beta = vec_ref[2:3, :]

    a = jnp.dot(x_ref[...], w1_ref[...], preferred_element_type=jnp.float32)
    a = jnp.maximum(a + b1, 0.0)                                   # [B, Hp]

    # BatchNorm1d (training mode, biased variance), single-pass statistics.
    inv_b = 1.0 / a.shape[0]
    s1 = jnp.sum(a, axis=0, keepdims=True)
    s2 = jnp.sum(a * a, axis=0, keepdims=True)
    mean = s1 * inv_b
    var = jnp.maximum(s2 * inv_b - mean * mean, 0.0)
    h = (a - mean) * jax.lax.rsqrt(var + BN_EPS) * gamma + beta
    hid_ref[...] = h.astype(hid_ref.dtype)                         # lane-dense store

    logits = jnp.dot(h, w2_ref[...], preferred_element_type=jnp.float32) + b2_ref[...]
    out_ref[...] = _softmax_rows(logits).astype(out_ref.dtype)     # lane-dense store


def _ddc_phase1_kernel(x_ref, w1_ref, vec_ref, a_ref, stats_ref):
    """Batch-tiled phase 1: a = ReLU(x@W1+b1); accumulate per-feature sum/sumsq."""
    @pl.when(pl.program_id(0) == 0)
    def _():
        stats_ref[...] = jnp.zeros_like(stats_ref)

    b1 = vec_ref[0:1, :]
    a = jnp.dot(x_ref[...], w1_ref[...], preferred_element_type=jnp.float32)
    a = jnp.maximum(a + b1, 0.0)
    a_ref[...] = a
    stats_ref[0:1, :] = stats_ref[0:1, :] + jnp.sum(a, axis=0, keepdims=True)
    stats_ref[1:2, :] = stats_ref[1:2, :] + jnp.sum(a * a, axis=0, keepdims=True)


def _ddc_phase2_kernel(a_ref, stats_ref, vec_ref, w2_ref, b2_ref,
                       out_ref, hid_ref, *, inv_b):
    """Batch-tiled phase 2: normalize + gamma/beta + W2 matmul + softmax."""
    gamma = vec_ref[1:2, :]
    beta = vec_ref[2:3, :]
    mean = stats_ref[0:1, :] * inv_b
    var = jnp.maximum(stats_ref[1:2, :] * inv_b - mean * mean, 0.0)

    h = (a_ref[...] - mean) * jax.lax.rsqrt(var + BN_EPS) * gamma + beta
    hid_ref[...] = h.astype(hid_ref.dtype)

    logits = jnp.dot(h, w2_ref[...], preferred_element_type=jnp.float32) + b2_ref[...]
    out_ref[...] = _softmax_rows(logits).astype(out_ref.dtype)


# ---------------------------------------------------------------------------
# pallas_call wrappers
# ---------------------------------------------------------------------------
def _vmem_spec():
    return pl.BlockSpec(memory_space=pltpu.MemorySpace.VMEM)


def _ddc_fused(x, w1_p, vec_p, w2_p, b2_p):
    B, D = x.shape
    Hp = w1_p.shape[1]
    Kp = w2_p.shape[1]
    flops = 2 * B * D * Hp + 2 * B * Hp * Kp + 12 * B * Hp + 6 * B * Kp
    transcendentals = B * Kp + B + Hp
    bytes_accessed = 4 * (B * D + D * Hp + 8 * Hp + Hp * Kp + Kp + B * Kp + B * Hp)
    return pl.pallas_call(
        _ddc_fused_kernel,
        out_shape=(jax.ShapeDtypeStruct((B, Kp), jnp.float32),
                   jax.ShapeDtypeStruct((B, Hp), jnp.float32)),
        in_specs=[_vmem_spec() for _ in range(5)],
        out_specs=(_vmem_spec(), _vmem_spec()),
        cost_estimate=pl.CostEstimate(flops=flops,
                                      transcendentals=transcendentals,
                                      bytes_accessed=bytes_accessed),
        compiler_params=pltpu.CompilerParams(vmem_limit_bytes=16 * 1024 * 1024),
    )(x, w1_p, vec_p, w2_p, b2_p)


def _ddc_tiled(x, w1_p, vec_p, w2_p, b2_p, bt):
    B, D = x.shape
    Hp = w1_p.shape[1]
    Kp = w2_p.shape[1]
    nb = B // bt

    # Phase 1: stream batch tiles, write ReLU activations, accumulate BN stats.
    a, stats = pl.pallas_call(
        _ddc_phase1_kernel,
        out_shape=(jax.ShapeDtypeStruct((B, Hp), jnp.float32),
                   jax.ShapeDtypeStruct((2, Hp), jnp.float32)),
        grid_spec=pltpu.PrefetchScalarGridSpec(
            num_scalar_prefetch=0, grid=(nb,),
            in_specs=[pl.BlockSpec((bt, D), lambda i: (i, 0)),
                      pl.BlockSpec((D, Hp), lambda i: (0, 0)),
                      pl.BlockSpec((8, Hp), lambda i: (0, 0))],
            out_specs=(pl.BlockSpec((bt, Hp), lambda i: (i, 0)),
                       pl.BlockSpec((2, Hp), lambda i: (0, 0)))),
        cost_estimate=pl.CostEstimate(
            flops=2 * B * D * Hp + 5 * B * Hp, transcendentals=0,
            bytes_accessed=4 * (B * D + D * Hp + 8 * Hp + B * Hp + 2 * Hp)),
        compiler_params=pltpu.CompilerParams(
            dimension_semantics=("arbitrary",),      # resident stats accumulator
            vmem_limit_bytes=32 * 1024 * 1024),
    )(x, w1_p, vec_p)

    # Phase 2: normalize + output head; batch axis fully parallel (v7x: 2 TCs).
    out_p, hid_p = pl.pallas_call(
        functools.partial(_ddc_phase2_kernel, inv_b=1.0 / B),
        out_shape=(jax.ShapeDtypeStruct((B, Kp), jnp.float32),
                   jax.ShapeDtypeStruct((B, Hp), jnp.float32)),
        grid_spec=pltpu.PrefetchScalarGridSpec(
            num_scalar_prefetch=0, grid=(nb,),
            in_specs=[pl.BlockSpec((bt, Hp), lambda i: (i, 0)),
                      pl.BlockSpec((2, Hp), lambda i: (0, 0)),
                      pl.BlockSpec((8, Hp), lambda i: (0, 0)),
                      pl.BlockSpec((Hp, Kp), lambda i: (0, 0)),
                      pl.BlockSpec((1, Kp), lambda i: (0, 0))],
            out_specs=(pl.BlockSpec((bt, Kp), lambda i: (i, 0)),
                       pl.BlockSpec((bt, Hp), lambda i: (i, 0)))),
        cost_estimate=pl.CostEstimate(
            flops=2 * B * Hp * Kp + 10 * B * Hp + 6 * B * Kp,
            transcendentals=B * Kp + B + nb * Hp,
            bytes_accessed=4 * (2 * B * Hp + Hp * Kp + B * Kp + 11 * Hp + Kp)),
        compiler_params=pltpu.CompilerParams(
            dimension_semantics=("parallel",),
            vmem_limit_bytes=32 * 1024 * 1024),
    )(a, stats, vec_p, w2_p, b2_p)
    return out_p, hid_p


def _pick_batch_tile(B):
    # 512-1024-row tiles reach ~85% of HBM roofline; f32 tiles stay <=1 MiB,
    # comfortably inside v7x's 64 MiB VMEM with double-buffering.
    for bt in (1024, 512, 256, 128, 64, 32, 16, 8):
        if B % bt == 0 and B // bt >= 2:
            return bt
    return None


@functools.partial(jax.jit, static_argnames=("batch_tile",))
def ddc_forward_padded(x, w1_p, vec_p, w2_p, b2_p, batch_tile=None):
    """Returns the padded (B, Kp) softmax output and (B, Hp) post-BN hidden.

    Padded lanes are exactly 0, so downstream consumers can keep the padded
    (lane-dense) layout; use ddc_forward() only if the unpadded shapes are
    truly required.
    """
    B = x.shape[0]
    bt = batch_tile
    if bt is None and B > _FUSED_MAX_B:
        bt = _pick_batch_tile(B)
    if bt is None or B % bt != 0 or B // bt < 2:
        return _ddc_fused(x, w1_p, vec_p, w2_p, b2_p)
    return _ddc_tiled(x, w1_p, vec_p, w2_p, b2_p, bt)


def ddc_forward(x, params, n_hidden, n_clusters, batch_tile=None):
    """Convenience wrapper that slices the padded slabs back to (B, K)/(B, H).

    Each slice is one extra HBM copy; prefer ddc_forward_padded when possible.
    """
    out_p, hid_p = ddc_forward_padded(x, *params, batch_tile=batch_tile)
    return out_p[:, :n_clusters], hid_p[:, :n_hidden]


def prepare_params(w1, b1, gamma, beta, w2, b2):
    """Pad / pack parameters ONCE at module-init time (off the forward path).

    - Hidden width H and cluster count K are padded to multiples of 128 so all
      kernel stores are unmasked full-lane stores.
    - b1 / gamma / beta are packed into rows 0 / 1 / 2 of one (8, Hp) slab so
      the kernel needs a single small per-feature input DMA instead of three.
    - Padded W2 rows are 0 and padded b2 columns are -1e30, so padded softmax
      columns come out exactly 0 (invariant: logits stay f32 before exp).
    """
    D, H = w1.shape
    K = w2.shape[1]
    Hp = _round_up(H, LANE)
    Kp = _round_up(K, LANE)

    w1_p = jnp.pad(w1.astype(jnp.float32), ((0, 0), (0, Hp - H)))
    vec_p = jnp.zeros((8, Hp), jnp.float32)
    vec_p = vec_p.at[0, :H].set(jnp.reshape(b1, (-1,)).astype(jnp.float32))
    vec_p = vec_p.at[1, :H].set(jnp.reshape(gamma, (-1,)).astype(jnp.float32))
    vec_p = vec_p.at[2, :H].set(jnp.reshape(beta, (-1,)).astype(jnp.float32))
    w2_p = jnp.pad(w2.astype(jnp.float32), ((0, Hp - H), (0, Kp - K)))
    b2_p = jnp.pad(jnp.reshape(b2, (1, K)).astype(jnp.float32),
                   ((0, 0), (0, Kp - K)), constant_values=NEG_PAD)
    return w1_p, vec_p, w2_p, b2_p


def _reference(x, w1, b1, gamma, beta, w2, b2):
    h = jnp.maximum(x @ w1 + b1, 0.0)
    mean = jnp.mean(h, axis=0, keepdims=True)
    var = jnp.mean((h - mean) ** 2, axis=0, keepdims=True)
    h = (h - mean) / jnp.sqrt(var + BN_EPS) * gamma + beta
    logits = h @ w2 + b2
    return jax.nn.softmax(logits, axis=1), h


if __name__ == "__main__":
    # Small shapes consistent with the module: input_dim=32, n_hidden=32,
    # n_clusters=10, batch=8.
    B, D, H, K = 8, 32, 32, 10
    Hp, Kp = _round_up(H, LANE), _round_up(K, LANE)

    key = jax.random.PRNGKey(0)
    kx, kw1, kb1, kw2, kb2, kx2 = jax.random.split(key, 6)

    x = jax.random.normal(kx, (B, D), dtype=jnp.float32)
    w1 = jax.random.uniform(kw1, (D, H), jnp.float32, -1.0, 1.0) / jnp.sqrt(D)
    b1 = jax.random.uniform(kb1, (1, H), jnp.float32, -1.0, 1.0) / jnp.sqrt(D)
    gamma = jnp.ones((1, H), jnp.float32)   # BatchNorm1d default weight
    beta = jnp.zeros((1, H), jnp.float32)   # BatchNorm1d default bias
    w2 = jax.random.uniform(kw2, (H, K), jnp.float32, -1.0, 1.0) / jnp.sqrt(H)
    b2 = jax.random.uniform(kb2, (1, K), jnp.float32, -1.0, 1.0) / jnp.sqrt(H)

    # Pad / pack once at "module init" time (off the per-call forward path).
    params = prepare_params(w1, b1, gamma, beta, w2, b2)

    # --- small-batch path (single fused kernel) -------------------------------
    out_p, hid_p = ddc_forward_padded(x, *params)
    out_p = jax.block_until_ready(out_p)
    hid_p = jax.block_until_ready(hid_p)
    assert out_p.shape == (B, Kp) and hid_p.shape == (B, Hp)

    out, hidden = out_p[:, :K], hid_p[:, :H]
    ref_out, ref_hidden = _reference(x, w1, b1, gamma, beta, w2, b2)
    assert jnp.allclose(out, ref_out, atol=1e-5, rtol=1e-5)
    assert jnp.allclose(hidden, ref_hidden, atol=1e-5, rtol=1e-5)
    assert jnp.allclose(jnp.sum(out, axis=1), 1.0, atol=1e-5)
    # Padded lanes are exactly zero -> consumers may keep the padded slab.
    assert jnp.all(out_p[:, K:] == 0.0) and jnp.all(hid_p[:, H:] == 0.0)

    # --- exercise the two-phase batch-tiled path (forced small tile) ----------
    B2 = 64
    x2 = jax.random.normal(kx2, (B2, D), dtype=jnp.float32)
    out2_p, hid2_p = ddc_forward_padded(x2, *params, batch_tile=16)
    out2_p = jax.block_until_ready(out2_p)
    hid2_p = jax.block_until_ready(hid2_p)
    ref_out2, ref_hid2 = _reference(x2, w1, b1, gamma, beta, w2, b2)
    assert jnp.allclose(out2_p[:, :K], ref_out2, atol=1e-4, rtol=1e-4)
    assert jnp.allclose(hid2_p[:, :H], ref_hid2, atol=1e-4, rtol=1e-4)
    assert jnp.allclose(jnp.sum(out2_p, axis=1), 1.0, atol=1e-4)

    print("KERNEL_OK")
</pallas_src>

<mosaic_0001>
module attributes {stable_mosaic.version = 11 : i64} {
  func.func @_ddc_fused_kernel(%arg0: memref<8x32xf32, #tpu.memory_space<vmem>>, %arg1: memref<32x128xf32, #tpu.memory_space<vmem>>, %arg2: memref<8x128xf32, #tpu.memory_space<vmem>>, %arg3: memref<128x128xf32, #tpu.memory_space<vmem>>, %arg4: memref<1x128xf32, #tpu.memory_space<vmem>>, %arg5: memref<8x128xf32, #tpu.memory_space<vmem>>, %arg6: memref<8x128xf32, #tpu.memory_space<vmem>>) attributes {dimension_semantics = [], scalar_prefetch = 0 : i64, scratch_operands = 0 : i64, tpu.core_type = #tpu.core_type<tc>} {
    %c0 = arith.constant 0 : index
    %c0_0 = arith.constant 0 : index
    %0 = vector.load %arg2[%c0, %c0_0] : memref<8x128xf32, #tpu.memory_space<vmem>>, vector<1x128xf32>
    %c1 = arith.constant 1 : index
    %c0_1 = arith.constant 0 : index
    %1 = vector.load %arg2[%c1, %c0_1] : memref<8x128xf32, #tpu.memory_space<vmem>>, vector<1x128xf32>
    %c2 = arith.constant 2 : index
    %c0_2 = arith.constant 0 : index
    %2 = vector.load %arg2[%c2, %c0_2] : memref<8x128xf32, #tpu.memory_space<vmem>>, vector<1x128xf32>
    %c0_3 = arith.constant 0 : index
    %c0_4 = arith.constant 0 : index
    %3 = vector.load %arg0[%c0_3, %c0_4] : memref<8x32xf32, #tpu.memory_space<vmem>>, vector<8x32xf32>
    %c0_5 = arith.constant 0 : index
    %c0_6 = arith.constant 0 : index
    %4 = vector.load %arg1[%c0_5, %c0_6] : memref<32x128xf32, #tpu.memory_space<vmem>>, vector<32x128xf32>
    %cst = arith.constant dense<0.000000e+00> : vector<8x128xf32>
    %5 = tpu.matmul %3, %4, %cst {dimension_numbers = #tpu.dot_dimension_numbers<[1], [0], [0], [1], [0, 0, 1, 1], [], []>} : vector<8x32xf32>, vector<32x128xf32>, vector<8x128xf32> -> vector<8x128xf32>
    %6 = vector.broadcast %0 : vector<1x128xf32> to vector<8x128xf32>
    %7 = arith.addf %5, %6 : vector<8x128xf32>
    %cst_7 = arith.constant 0.000000e+00 : f32
    %8 = vector.broadcast %cst_7 : f32 to vector<8x128xf32>
    %9 = arith.maximumf %7, %8 : vector<8x128xf32>
    %cst_8 = arith.constant dense<0.000000e+00> : vector<128xf32>
    %10 = vector.multi_reduction <add>, %9, %cst_8 [0] : vector<8x128xf32> to vector<128xf32>
    %11 = vector.shape_cast %10 : vector<128xf32> to vector<1x128xf32>
    %12 = arith.mulf %9, %9 : vector<8x128xf32>
    %cst_9 = arith.constant dense<0.000000e+00> : vector<128xf32>
    %13 = vector.multi_reduction <add>, %12, %cst_9 [0] : vector<8x128xf32> to vector<128xf32>
    %14 = vector.shape_cast %13 : vector<128xf32> to vector<1x128xf32>
    %cst_10 = arith.constant 1.250000e-01 : f32
    %15 = vector.broadcast %cst_10 : f32 to vector<1x128xf32>
    %16 = arith.mulf %11, %15 : vector<1x128xf32>
    %cst_11 = arith.constant 1.250000e-01 : f32
    %17 = vector.broadcast %cst_11 : f32 to vector<1x128xf32>
    %18 = arith.mulf %14, %17 : vector<1x128xf32>
    %19 = arith.mulf %16, %16 : vector<1x128xf32>
    %20 = arith.subf %18, %19 : vector<1x128xf32>
    %cst_12 = arith.constant 0.000000e+00 : f32
    %21 = vector.broadcast %cst_12 : f32 to vector<1x128xf32>
    %22 = arith.maximumf %20, %21 : vector<1x128xf32>
    %23 = vector.broadcast %16 : vector<1x128xf32> to vector<8x128xf32>
    %24 = arith.subf %9, %23 : vector<8x128xf32>
    %cst_13 = arith.constant 9.99999974E-6 : f32
    %25 = vector.broadcast %cst_13 : f32 to vector<1x128xf32>
    %26 = arith.addf %22, %25 : vector<1x128xf32>
    %27 = math.rsqrt %26 : vector<1x128xf32>
    %28 = vector.broadcast %27 : vector<1x128xf32> to vector<8x128xf32>
    %29 = arith.mulf %24, %28 : vector<8x128xf32>
    %30 = vector.broadcast %1 : vector<1x128xf32> to vector<8x128xf32>
    %31 = arith.mulf %29, %30 : vector<8x128xf32>
    %32 = vector.broadcast %2 : vector<1x128xf32> to vector<8x128xf32>
    %33 = arith.addf %31, %32 : vector<8x128xf32>
    %c0_14 = arith.constant 0 : index
    %c0_15 = arith.constant 0 : index
    %34 = vector.load %arg6[%c0_14, %c0_15] : memref<8x128xf32, #tpu.memory_space<vmem>>, vector<8x128xf32>
    tpu.vector_store %arg6[%c0_14, %c0_15], %33 {strides = array<i32>} : memref<8x128xf32, #tpu.memory_space<vmem>>, vector<8x128xf32>,
    %c0_16 = arith.constant 0 : index
    %c0_17 = arith.constant 0 : index
    %35 = vector.load %arg3[%c0_16, %c0_17] : memref<128x128xf32, #tpu.memory_space<vmem>>, vector<128x128xf32>
    %cst_18 = arith.constant dense<0.000000e+00> : vector<8x128xf32>
    %36 = tpu.matmul %33, %35, %cst_18 {dimension_numbers = #tpu.dot_dimension_numbers<[1], [0], [0], [1], [0, 0, 1, 1], [], []>} : vector<8x128xf32>, vector<128x128xf32>, vector<8x128xf32> -> vector<8x128xf32>
    %c0_19 = arith.constant 0 : index
    %c0_20 = arith.constant 0 : index
    %37 = vector.load %arg4[%c0_19, %c0_20] : memref<1x128xf32, #tpu.memory_space<vmem>>, vector<1x128xf32>
    %38 = vector.broadcast %37 : vector<1x128xf32> to vector<8x128xf32>
    %39 = arith.addf %36, %38 : vector<8x128xf32>
    %cst_21 = arith.constant dense<0xFF800000> : vector<8xf32>
    %40 = vector.multi_reduction <maximumf>, %39, %cst_21 [1] : vector<8x128xf32> to vector<8xf32>
    %41 = vector.shape_cast %40 : vector<8xf32> to vector<8x1xf32>
    %42 = vector.broadcast %41 : vector<8x1xf32> to vector<8x128xf32>
    %43 = arith.subf %39, %42 : vector<8x128xf32>
    %44 = math.exp %43 : vector<8x128xf32>
    %cst_22 = arith.constant dense<0.000000e+00> : vector<8xf32>
    %45 = vector.multi_reduction <add>, %44, %cst_22 [1] : vector<8x128xf32> to vector<8xf32>
    %46 = vector.shape_cast %45 : vector<8xf32> to vector<8x1xf32>
    %47 = tpu.reciprocal %46 {approx = true} : vector<8x1xf32> -> vector<8x1xf32>
    %48 = arith.mulf %46, %47 : vector<8x1xf32>
    %cst_23 = arith.constant 2.000000e+00 : f32
    %49 = vector.broadcast %cst_23 : f32 to vector<8x1xf32>
    %50 = arith.subf %49, %48 : vector<8x1xf32>
    %51 = arith.mulf %47, %50 : vector<8x1xf32>
    %52 = vector.broadcast %51 : vector<8x1xf32> to vector<8x128xf32>
    %53 = arith.mulf %44, %52 : vector<8x128xf32>
    %c0_24 = arith.constant 0 : index
    %c0_25 = arith.constant 0 : index
    %54 = vector.load %arg5[%c0_24, %c0_25] : memref<8x128xf32, #tpu.memory_space<vmem>>, vector<8x128xf32>
    tpu.vector_store %arg5[%c0_24, %c0_25], %53 {strides = array<i32>} : memref<8x128xf32, #tpu.memory_space<vmem>>, vector<8x128xf32>,
    return
  }
}

</mosaic_0001>

<bundles_post_ra>
// kernel: ddc_forward_padded.1
= control target key start
LH: loop header
LB: loop body
LE: loop exit
PB: predicated region body
PF: predicated region fallthrough
CT: control target
= control target key end

     0   :  { %12 = vsyncpa [#allocation3], 0  ;;  %s645_s0 = inlined_call_operand.hbm [shape: f32[8,32], index: 0, kind: input, shape index: {}]   ;;  %s646_s1 = inlined_call_operand.hbm [shape: f32[32,128], index: 1, kind: input, shape index: {}]   ;;  %s647_s2 = inlined_call_operand.hbm [shape: f32[8,128], index: 2, kind: input, shape index: {}]   ;;  %s648_s3 = inlined_call_operand.hbm [shape: f32[128,128], index: 3, kind: input, shape index: {}]   ;;  %s649_s4 = inlined_call_operand.vmem [shape: f32[1,128], index: 4, kind: input, shape index: {}]   ;;  %s650_s5 = inlined_call_operand.hbm [shape: f32[8,128], index: 5, kind: output, shape index: {0}]   ;;  %s651_s6 = inlined_call_operand.hbm [shape: f32[8,128], index: 6, kind: output, shape index: {1}]  }
   0x1   :  { %13 = vsyncpa [#allocation6], 0 }
   0x2   :  { %14 = vsyncpa [#allocation9], 0 }
   0x3   :  { %15 = vsyncpa [#allocation4], 0 }
   0x4   :  { %16 = vsyncpa [#allocation12], 0  ;;  %s551_s21 = smov [#allocation5]  }
   0x5   :  { %s32_s22 = sshll.u32 %s551_s21, 4  ;;  %s33_s22 = int_to_ptr.vmem [resolvable:$true] %s32_s22 }
   0x6   :  { %s429_s23 = scalar_lea.vmem %s33_s22, 512  ;;  %p434_p1 = scmp.lt.s32.totalorder %s33_s22, %s33_s22 }
   0x7   :  { %p430_p0 = scmp.ne.s32.totalorder %s33_s22, %s429_s23  ;;  %p435_p2 = scmp.lt.s32.totalorder %s429_s23, %s429_s23 }
   0x9   :  { %p436_p3 = por %p435_p2, %p434_p1 }
   0xb   :  { %p437_p4 = pnand %p436_p3, %p430_p0 }
   0xd   :  { %440 = shalt.err (!%p437_p4)
}
   0xe   :  { %s552_s24 = smov 128   ;;  %s553_s25 = smov 8  }
   0xf   :  { %38 = dma.hbm_to_vmem [thread:$0]  %s646_s1, 512, %s33_s22, [#allocation6], %s552_s24, %s552_s24, %s553_s25  }
  0x10   :  { %s554_s28 = smov [#allocation2]   ;;  %s555_s30 = smov [#allocation7]  }
  0x11   :  { %s23_s29 = sshll.u32 %s554_s28, 4  ;;  %s45_s7 = sshll.u32 %s555_s30, 4  ;;  %s24_s29 = int_to_ptr.vmem [resolvable:$true] %s23_s29  ;;  %s46_s7 = int_to_ptr.vmem [resolvable:$true] %s45_s7 }
  0x12   :  { %s449_s8 = scalar_lea.vmem %s24_s29, 128  ;;  %p454_p6 = scmp.lt.s32.totalorder %s24_s29, %s24_s29 }
  0x13   :  { %p450_p5 = scmp.ne.s32.totalorder %s24_s29, %s449_s8  ;;  %p455_p7 = scmp.lt.s32.totalorder %s449_s8, %s449_s8 }
  0x15   :  { %p456_p8 = por %p455_p7, %p454_p6 }
  0x17   :  { %p457_p9 = pnand %p456_p8, %p450_p5 }
  0x19   :  { %460 = shalt.err (!%p457_p9)
}
  0x1a   :  { %26 = dma.hbm_to_vmem [thread:$0]  %s645_s0, 128, %s24_s29, [#allocation3]  }
  0x1b   :  { %s469_s11 = scalar_lea.vmem %s46_s7, 128  ;;  %p474_p11 = scmp.lt.s32.totalorder %s46_s7, %s46_s7 }
  0x1c   :  { %p470_p10 = scmp.ne.s32.totalorder %s46_s7, %s469_s11  ;;  %p475_p12 = scmp.lt.s32.totalorder %s469_s11, %s469_s11 }
  0x1e   :  { %p476_p13 = por %p475_p12, %p474_p11 }
  0x20   :  { %p477_p0 = pnand %p476_p13, %p470_p10 }
  0x22   :  { %480 = shalt.err (!%p477_p0)
}
  0x23   :  { %48 = dma.hbm_to_vmem [thread:$0]  %s647_s2, 128, %s46_s7, [#allocation6]  }
  0x24   :  { %s556_s13 = smov [#allocation8]  }
  0x25   :  { %s54_s14 = sshll.u32 %s556_s13, 4  ;;  %s55_s14 = int_to_ptr.vmem [resolvable:$true] %s54_s14 }
  0x26   :  { %s489_s15 = scalar_lea.vmem %s55_s14, 2048  ;;  %p494_p2 = scmp.lt.s32.totalorder %s55_s14, %s55_s14 }
  0x27   :  { %p490_p1 = scmp.ne.s32.totalorder %s55_s14, %s489_s15  ;;  %p495_p3 = scmp.lt.s32.totalorder %s489_s15, %s489_s15 }
  0x29   :  { %p496_p4 = por %p495_p3, %p494_p2 }
  0x2b   :  { %p497_p5 = pnand %p496_p4, %p490_p1 }
  0x2d   :  { %500 = shalt.err (!%p497_p5)
}
  0x2e   :  { %60 = dma.hbm_to_vmem [thread:$0]  %s648_s3, 2048, %s55_s14, [#allocation9], %s552_s24, %s552_s24, %s553_s25  }
  0x2f   :  { %541 = dma.done.wait [#allocation3], 128  }
  0x30   :  { %542 = vsyncadd [#allocation3], 4294967168 }
  0x31   :  { %543 = dma.done.wait [#allocation6], 640  }
  0x32   :  { %544 = vsyncadd [#allocation6], 4294966656 }
  0x33   :  { %545 = dma.done.wait [#allocation9], 2048  }
  0x34   :  { %546 = vsyncadd [#allocation9], 4294965248  ;;  %v557_v0 = vmov 0.0   ;;  %vm558_vm0 = vmmov 0   ;;  %v82_v1 = vld [vmem:[#allocation5 + $0x18] sm:$0xff]  ;;  %v81_v2 = vld [vmem:[#allocation5 + $0x10] sm:$0xff] }
  0x35   :  { %359 = vmatprep.subr.mxu0 %v557_v0  ;;  %367 = vmatprep.mubr.msk.f32.mxu0 %vm558_vm0, %v557_v0  ;;  %v80_v3 = vld [vmem:[#allocation5 + $0x8] sm:$0xff]  ;;  %v79_v4 = vld [vmem:[#allocation5] sm:$0xff]  ;;  %v78_v5 = vld [vmem:[#allocation2] sm:$0xff]  ;;  %vm87_vm1 = vcmask 261120   ;;  %s559_s17 = smov [#allocation11]  }
  0x36   :  { %370 = vmatprep.subr.mxu1 %v557_v0  ;;  %402 = vmatprep.mubr.msk.f32.mxu1 %vm558_vm0, %v557_v0  ;;  %v210_v6 = vld [vmem:[#allocation8 + $0x78] sm:$0xff]  ;;  %v209_v7 = vld [vmem:[#allocation8 + $0x70] sm:$0xff]  ;;  %v208_v8 = vld [vmem:[#allocation8 + $0x68] sm:$0xff]  ;;  %s317_s18 = sshll.u32 %s559_s17, 4  ;;  %s318_s18 = int_to_ptr.vmem [resolvable:$true] %s317_s18 }
  0x37   :  { %360 = vmatpush3.msra.mxu0 %v82_v1  ;;  %371 = vmatpush3.msra.mxu1 %v210_v6  ;;  %v207_v9 = vld [vmem:[#allocation8 + $0x60] sm:$0xff]  ;;  %v206_v10 = vld [vmem:[#allocation8 + $0x58] sm:$0xff]  ;;  %v205_v11 = vld [vmem:[#allocation8 + $0x50] sm:$0xff]  ;;  %s501_s19 = scalar_lea.vmem %s318_s18, 128  ;;  %p506_p7 = scmp.lt.s32.totalorder %s318_s18, %s318_s18 }
  0x38   :  { %361 = vmatprep.subr.mxu0 %v557_v0  ;;  %372 = vmatprep.subr.mxu1 %v557_v0  ;;  %v204_v12 = vld [vmem:[#allocation8 + $0x48] sm:$0xff]  ;;  %v203_v13 = vld [vmem:[#allocation8 + $0x40] sm:$0xff]  ;;  %v202_v14 = vld [vmem:[#allocation8 + $0x38] sm:$0xff]  ;;  %p502_p6 = scmp.ne.s32.totalorder %s318_s18, %s501_s19  ;;  %p507_p8 = scmp.lt.s32.totalorder %s501_s19, %s501_s19 }
  0x39   :  { %362 = vmatpush3.msra.mxu0 %v81_v2  ;;  %373 = vmatpush3.msra.mxu1 %v209_v7  ;;  %v201_v15 = vld [vmem:[#allocation8 + $0x30] sm:$0xff]  ;;  %v200_v16 = vld [vmem:[#allocation8 + $0x28] sm:$0xff]  ;;  %v199_v17 = vld [vmem:[#allocation8 + $0x20] sm:$0xff] }
  0x3a   :  { %363 = vmatprep.subr.mxu0 %v557_v0  ;;  %374 = vmatprep.subr.mxu1 %v557_v0  ;;  %v198_v18 = vld [vmem:[#allocation8 + $0x18] sm:$0xff]  ;;  %v197_v19 = vld [vmem:[#allocation8 + $0x10] sm:$0xff]  ;;  %v196_v20 = vld [vmem:[#allocation8 + $0x8] sm:$0xff]  ;;  %p508_p9 = por %p507_p8, %p506_p7 }
  0x3b   :  { %364 = vmatpush3.msra.mxu0 %v80_v3  ;;  %375 = vmatpush3.msra.mxu1 %v208_v8  ;;  %v195_v21 = vld [vmem:[#allocation8] sm:$0xff]  ;;  %v332_v22 = vld [vmem:[#allocation7] ss:$0 sm:$0xff]  ;;  %v334_v48 = vld [vmem:[#allocation7 + $0x1] ss:$0 sm:$0xff] }
  0x3c   :  { %365 = vmatprep.subr.mxu0 %v557_v0  ;;  %376 = vmatprep.subr.mxu1 %v557_v0  ;;  %v335_v50 = vld [vmem:[#allocation7 + $0x2] ss:$0 sm:$0xff]  ;;  %v336_v53 = vld [vmem:[%s649_s4] ss:$0 sm:$0xff]  ;;  %p509_p10 = pnand %p508_p9, %p502_p6 }
  0x3d   :  { %366 = vmatpush3.msra.mxu0 %v79_v4  ;;  %377 = vmatpush3.msra.mxu1 %v207_v9 }
  0x3e   :  { %368 = vmatmul.mubr.msk.f32.vlgmr.msra.gmra.mxu0 %vm87_vm1, %v78_v5  ;;  %378 = vmatprep.subr.mxu1 %v557_v0 }
  0x3f   :  { %379 = vmatpush3.msra.mxu1 %v206_v10 }
  0x40   :  { %380 = vmatprep.subr.mxu1 %v557_v0 }
  0x41   :  { %381 = vmatpush3.msra.mxu1 %v205_v11 }
  0x42   :  { %382 = vmatprep.subr.mxu1 %v557_v0 }
  0x43   :  { %383 = vmatpush3.msra.mxu1 %v204_v12 }
  0x44   :  { %384 = vmatprep.subr.mxu1 %v557_v0 }
  0x45   :  { %385 = vmatpush3.msra.mxu1 %v203_v13 }
  0x46   :  { %386 = vmatprep.subr.mxu1 %v557_v0 }
  0x47   :  { %387 = vmatpush3.msra.mxu1 %v202_v14 }
  0x48   :  { %388 = vmatprep.subr.mxu1 %v557_v0 }
  0x49   :  { %389 = vmatpush3.msra.mxu1 %v201_v15 }
  0x4a   :  { %390 = vmatprep.subr.mxu1 %v557_v0 }
  0x4b   :  { %391 = vmatpush3.msra.mxu1 %v200_v16 }
  0x4c   :  { %392 = vmatprep.subr.mxu1 %v557_v0 }
  0x4d   :  { %393 = vmatpush3.msra.mxu1 %v199_v17 }
  0x4e   :  { %394 = vmatprep.subr.mxu1 %v557_v0 }
  0x4f   :  { %395 = vmatpush3.msra.mxu1 %v198_v18 }
  0x50   :  { %396 = vmatprep.subr.mxu1 %v557_v0 }
  0x51   :  { %397 = vmatpush3.msra.mxu1 %v197_v19 }
  0x52   :  { %398 = vmatprep.subr.mxu1 %v557_v0 }
  0x53   :  { %399 = vmatpush3.msra.mxu1 %v196_v20 }
  0x54   :  { %400 = vmatprep.subr.mxu1 %v557_v0 }
  0x55   :  { %401 = vmatpush3.msra.mxu1 %v195_v21 }
  0xfe   :  { %v157_v23 = vpop.f32.mrf.mxu0 }
  0xff   :  { %v158_v24 = vadd.f32 %v332_v22, %v157_v23 }
 0x100   :  { %v369_v25 = vpop.f32.mrf.mxu0 }
 0x101   :  { %v161_v26 = vmax.f32 %v158_v24, 0.0 }
 0x103   :  { %v162_v27 = vrot.slane %v161_v26, 4  ;;  %v168_v28 = vmul.f32 %v161_v26, %v161_v26 }
 0x105   :  { %v163_v29 = vadd.f32 %v162_v27, %v161_v26  ;;  %v169_v30 = vrot.slane %v168_v28, 4 }
 0x107   :  { %v164_v31 = vrot.slane %v163_v29, 2  ;;  %v170_v32 = vadd.f32 %v169_v30, %v168_v28 }
 0x109   :  { %v165_v33 = vadd.f32 %v164_v31, %v163_v29  ;;  %v171_v34 = vrot.slane %v170_v32, 2 }
 0x10b   :  { %v166_v35 = vrot.slane %v165_v33, 1  ;;  %v172_v36 = vadd.f32 %v171_v34, %v170_v32 }
 0x10d   :  { %v167_v37 = vadd.f32 %v166_v35, %v165_v33  ;;  %v173_v38 = vrot.slane %v172_v36, 1 }
 0x10f   :  { %v174_v39 = vadd.f32 %v173_v38, %v172_v36  ;;  %v175_v40 = vmul.f32 0.125, %v167_v37 }
 0x111   :  { %v176_v41 = vmul.f32 0.125, %v174_v39  ;;  %v177_v42 = vmul.f32 %v175_v40, %v175_v40  ;;  %v180_v46 = vsub.f32 %v161_v26, %v175_v40 }
 0x113   :  { %v178_v43 = vsub.f32 %v176_v41, %v177_v42 }
 0x115   :  { %v179_v44 = vmax.f32 %v178_v43, 0.0 }
 0x117   :  { %v181_v45 = vadd.f32 1e-05, %v179_v44 }
 0x119   :  { %415 = vrsqrt.f32 %v181_v45 }
 0x126   :  { %v416_v47 = vpop.eup %415 }
 0x127   :  { %v183_v49 = vmul.f32 %v416_v47, %v180_v46 }
 0x129   :  { %v188_v51 = vmul.f32 %v334_v48, %v183_v49 }
 0x12b   :  { %v193_v52 = vadd.f32 %v335_v50, %v188_v51 }
 0x12d   :  { %403 = vmatmul.mubr.f32.vlgmr.msra.gmra.mxu1 %v193_v52  ;;  %194 = vst [vmem:[#allocation11] sm:$0xff] %v193_v52 }
 0x1ed   :  { %v284_v54 = vpop.f32.mrf.mxu1 }
 0x1ee   :  { %v285_v55 = vadd.f32 %v336_v53, %v284_v54 }
 0x1ef   :  { %v404_v56 = vpop.f32.mrf.mxu1 }
 0x1f0   :  { %288 = vmax.xlane.f32.xlu0 %v285_v55 }
 0x279   :  { %v289_v57 = vpop.xlane.xlu0 %288 }
 0x27a   :  { %v290_v58 = vsub.f32 %v285_v55, %v289_v57 }
 0x27c   :  { %v291_v59 = vmul.f32 1.442695, %v290_v58 }
 0x27e   :  { %417 = vpow2.f32 %v291_v59 }
 0x28b   :  { %v418_v60 = vpop.eup %417 }
 0x28c   :  { %293 = vadd.xlane.f32.xlu0 %v418_v60 }
 0x28d   :  { %512 = shalt.err (!%p509_p10)
}
 0x28e   :  { %320 = dma.vmem_to_hbm [thread:$0]  %s318_s18, 128, %s651_s6, [#allocation12]  }
 0x28f   :  { %s560_s21 = smov [#allocation10]  }
 0x290   :  { %s307_s22 = sshll.u32 %s560_s21, 4  ;;  %s308_s22 = int_to_ptr.vmem [resolvable:$true] %s307_s22 }
 0x291   :  { %s521_s23 = scalar_lea.vmem %s308_s22, 128  ;;  %p526_p12 = scmp.lt.s32.totalorder %s308_s22, %s308_s22 }
 0x292   :  { %p522_p11 = scmp.ne.s32.totalorder %s308_s22, %s521_s23  ;;  %p527_p13 = scmp.lt.s32.totalorder %s521_s23, %s521_s23 }
 0x294   :  { %p528_p0 = por %p527_p13, %p526_p12 }
 0x296   :  { %p529_p1 = pnand %p528_p0, %p522_p11 }
 0x315   :  { %v294_v61 = vpop.xlane.xlu0 %293 }
 0x316   :  { %419 = vrcp.f32 %v294_v61 }
 0x323   :  { %v420_v62 = vpop.eup %419 }
 0x324   :  { %v296_v63 = vmul.f32 %v420_v62, %v294_v61 }
 0x326   :  { %v297_v0 = vsub.f32 2.0, %v296_v63 }
 0x328   :  { %v298_v1 = vmul.f32 %v420_v62, %v297_v0 }
 0x32a   :  { %v299_v2 = vmul.f32 %v418_v60, %v298_v1 }
 0x32c   :  { %300 = vst [vmem:[#allocation10] sm:$0xff] %v299_v2 }
 0x32d   :  { %532 = shalt.err (!%p529_p1)
}
 0x32e   :  { %310 = dma.vmem_to_hbm [thread:$0]  %s308_s22, 128, %s650_s5, [#allocation4]  }
 0x32f   :  { %547 = dma.done.wait [#allocation4], 128  }
 0x330   :  { %548 = vsyncadd [#allocation4], 4294967168 }
 0x331   :  { %549 = dma.done.wait [#allocation12], 128  }
 0x332   :  { %550 = vsyncadd [#allocation12], 4294967168 }
 0x333   :  { %327 = vsyncpa [#allocation3], 1 }
 0x334   :  { %328 = vsyncpa [#allocation6], 1 }
 0x335   :  { %329 = vsyncpa [#allocation9], 1 }
 0x336   :  { %330 = vsyncpa [#allocation4], 1 }
 0x337   :  { %331 = vsyncpa [#allocation12], 1 }

</bundles_post_ra>
